<compile_context>
chip_gen: v5e
topology: v5e:2x2
jax: 0.10.0
libtpu: 0.0.40
codegen_flags: <defaults>
</compile_context>

<pallas_src>
import functools

import numpy as np
import jax
import jax.numpy as jnp
from jax import lax
from jax.experimental import pallas as pl
from jax.experimental.pallas import tpu as pltpu

# config.* stand-ins (the module has no learned parameters)
PRIM_NUM = 4          # config.primNum
N_SAMPLE_POINTS = 8   # config.nSamplePoints
BATCH = 2             # config.batchSize

_LANE = 128
_ROW = 8               # primitive rows per tile (sublane granularity)


def _round_up(x, m):
    return ((x + m - 1) // m) * m


def _tsdf_transform_kernel(point_ref, shape_ref, trans_ref, quat_ref, tsdf_ref,
                           *, if_mutex, chunk):
    """One (tn primitives) x (tv sample points) tile of tsdfTransform.forward.

    point_ref : (3, tn, tv) f32  x/y/z planes, lane-dense along V
    shape_ref : (tn, 3)     f32  per-primitive half-extents
    trans_ref : (tn, 3)     f32  per-primitive translation
    quat_ref  : (tn, 4)     f32  per-primitive quaternion (w, x, y, z)
    tsdf_ref  : (tn, tv)    f32  output TSDF tile
    """
    tv = tsdf_ref.shape[1]

    # ---- per-primitive scalars: computed ONCE per grid step, kept (tn,1) ----
    quat = quat_ref[...]
    qw = quat[:, 0:1]; qx = quat[:, 1:2]; qy = quat[:, 2:3]; qz = quat[:, 3:4]

    ww = qw * qw; xx = qx * qx; yy = qy * qy; zz = qz * qz
    wx = qw * qx; wy = qw * qy; wz = qw * qz
    xy = qx * qy; xz = qx * qz; yz = qy * qz

    # Non-normalized rotation matrix of q (x) (0,v) (x) conj(q); includes the
    # |q|^2 scale exactly like the PyTorch Hamilton-product path.
    r00 = ww + xx - yy - zz
    r01 = 2.0 * (xy - wz)
    r02 = 2.0 * (xz + wy)
    r10 = 2.0 * (xy + wz)
    r11 = ww - xx + yy - zz
    r12 = 2.0 * (yz - wx)
    r20 = 2.0 * (xz - wy)
    r21 = 2.0 * (yz + wx)
    r22 = ww - xx - yy + zz

    trans = trans_ref[...]
    tx = trans[:, 0:1]; ty = trans[:, 1:2]; tz = trans[:, 2:3]
    # r = R (p - t) = R p - c  with  c = R t
    cx = r00 * tx + r01 * ty + r02 * tz
    cy = r10 * tx + r11 * ty + r12 * tz
    cz = r20 * tx + r21 * ty + r22 * tz

    sabs = jnp.abs(shape_ref[...])
    sx = sabs[:, 0:1]; sy = sabs[:, 1:2]; sz = sabs[:, 2:3]

    n_chunks = tv // chunk

    # ---- lane-chunked hot loop: live set stays in vregs (no VMEM spills) ----
    def body(c, carry):
        start = pl.multiple_of(c * chunk, chunk)
        px = point_ref[0, :, pl.ds(start, chunk)]
        py = point_ref[1, :, pl.ds(start, chunk)]
        pz = point_ref[2, :, pl.ds(start, chunk)]

        ax = jnp.abs(r00 * px + r01 * py + r02 * pz - cx)
        ay = jnp.abs(r10 * px + r11 * py + r12 * pz - cy)
        az = jnp.abs(r20 * px + r21 * py + r22 * pz - cz)

        if if_mutex:
            dx = jnp.maximum(sx - ax, 0.0)
            dy = jnp.maximum(sy - ay, 0.0)
            dz = jnp.maximum(sz - az, 0.0)
            res = jnp.minimum(jnp.minimum(dx * dx, dy * dy), dz * dz)
        else:
            dx = jnp.maximum(ax - sx, 0.0)
            dy = jnp.maximum(ay - sy, 0.0)
            dz = jnp.maximum(az - sz, 0.0)
            res = dx * dx + dy * dy + dz * dz

        tsdf_ref[:, pl.ds(start, chunk)] = res
        return carry

    lax.fori_loop(0, n_chunks, body, 0, unroll=(n_chunks <= 8))


@functools.partial(jax.jit, static_argnames=("if_mutex", "tile_v"))
def tsdf_transform_pallas(point, shape, trans, quat, if_mutex=False,
                          tile_v=None):
    """tsdfTransform.forward: point (B,P,V,3), shape/trans (B,P,3),
    quat (B,P,4) -> tsdf (B,P,V)."""
    point = jnp.asarray(point, jnp.float32)
    shape = jnp.asarray(shape, jnp.float32)
    trans = jnp.asarray(trans, jnp.float32)
    quat = jnp.asarray(quat, jnp.float32)

    B, P, V, _ = point.shape
    N = B * P

    # -- primitive-axis tiling: pad N to a multiple of 8, 8 rows per tile -----
    Np = _round_up(max(N, _ROW), _ROW)
    tn = _ROW

    # -- sample-point-axis tiling: lane pad, then size tv toward ~1 MiB DMA ---
    Vp = _round_up(V, _LANE)
    if tile_v is None:
        target = max(_LANE, ((1 << 20) // (12 * tn)) // _LANE * _LANE)
    else:
        target = max(_LANE, (int(tile_v) // _LANE) * _LANE)
    tv = min(Vp, target)
    n_vtiles = pl.cdiv(Vp, tv)
    tv = _round_up(pl.cdiv(Vp, n_vtiles), _LANE)     # rebalance tiles
    Vp2 = n_vtiles * tv                              # pad tail <= 127*n_vtiles
    chunk = 256 if tv % 256 == 0 else _LANE

    # -- SoA, lane-dense layout: (3, Np, Vp2) ---------------------------------
    # TODO(synk): take a pre-transposed SoA point cloud to skip this HBM pass.
    pt = jnp.transpose(point.reshape(N, V, 3), (2, 0, 1))          # (3, N, V)
    pt = jnp.pad(pt, ((0, 0), (0, Np - N), (0, Vp2 - V)))

    sh2 = jnp.pad(shape.reshape(N, 3), ((0, Np - N), (0, 0)))
    tr2 = jnp.pad(trans.reshape(N, 3), ((0, Np - N), (0, 0)))
    qt2 = jnp.pad(quat.reshape(N, 4), ((0, Np - N), (0, 0)))

    grid = (Np // tn, Vp2 // tv)

    # VMEM budget: double-buffered point + output blocks (+ headroom).
    per_step = (3 * tn * tv + tn * tv) * 4
    vmem_limit = int(min(32 << 20, max(8 << 20, 4 * per_step)))

    kernel = functools.partial(_tsdf_transform_kernel,
                               if_mutex=bool(if_mutex), chunk=chunk)
    out = pl.pallas_call(
        kernel,
        out_shape=jax.ShapeDtypeStruct((Np, Vp2), jnp.float32),
        grid=grid,
        in_specs=[
            pl.BlockSpec((3, tn, tv), lambda n, v: (0, n, v)),   # point planes
            pl.BlockSpec((tn, 3), lambda n, v: (n, 0)),          # shape
            pl.BlockSpec((tn, 3), lambda n, v: (n, 0)),          # trans
            pl.BlockSpec((tn, 4), lambda n, v: (n, 0)),          # quat
        ],
        out_specs=pl.BlockSpec((tn, tv), lambda n, v: (n, v)),
        compiler_params=pltpu.CompilerParams(
            dimension_semantics=("parallel", "parallel"),   # megacore on v7x
            vmem_limit_bytes=vmem_limit),
    )(pt, sh2, tr2, qt2)

    # Padded rows/lanes computed benign values; slice them off.
    return out[:N, :V].reshape(B, P, V)


def _numpy_reference(point, shape, trans, quat, if_mutex=False):
    """Pure-numpy mirror of the PyTorch forward."""
    point = np.asarray(point, np.float32)
    shape = np.asarray(shape, np.float32)
    trans = np.asarray(trans, np.float32)
    quat = np.asarray(quat, np.float32)

    p1 = point - trans[:, :, None, :]
    p4 = np.concatenate([np.zeros_like(p1[..., :1]), p1], axis=-1)
    q = np.broadcast_to(quat[:, :, None, :], p4.shape)

    def ham(a, b):
        w1, x1, y1, z1 = (a[..., i] for i in range(4))
        w2, x2, y2, z2 = (b[..., i] for i in range(4))
        return np.stack([w1 * w2 - x1 * x2 - y1 * y2 - z1 * z2,
                         w1 * x2 + x1 * w2 + y1 * z2 - z1 * y2,
                         w1 * y2 - x1 * z2 + y1 * w2 + z1 * x2,
                         w1 * z2 + x1 * y2 - y1 * x2 + z1 * w2], axis=-1)

    qc = q * np.array([1.0, -1.0, -1.0, -1.0], dtype=np.float32)
    pr = ham(ham(q, p4), qc)[..., 1:4]
    pabs = np.abs(pr)
    sabs = np.abs(shape)[:, :, None, :]
    if if_mutex:
        d = np.maximum(sabs - pabs, 0.0)
        return np.min(d * d, axis=-1)
    d = np.maximum(pabs - sabs, 0.0)
    return np.sum(d * d, axis=-1)


if __name__ == "__main__":
    root = jax.random.PRNGKey(0)
    k_small, k_big = jax.random.split(root)

    def make_inputs(key, B, P, V):
        kp, ks, kt, kq = jax.random.split(key, 4)
        pt = jax.random.normal(kp, (B, P, V, 3), dtype=jnp.float32)
        sh = jax.random.uniform(ks, (B, P, 3), dtype=jnp.float32,
                                minval=0.2, maxval=1.0)
        tr = 0.1 * jax.random.normal(kt, (B, P, 3), dtype=jnp.float32)
        qt = jax.random.normal(kq, (B, P, 4), dtype=jnp.float32)
        qt = qt / jnp.linalg.norm(qt, axis=-1, keepdims=True)
        return pt, sh, tr, qt

    # config-sized demo: batch=2, primNum=4, nSamplePoints=8
    pt, sh, tr, qt = make_inputs(k_small, BATCH, PRIM_NUM, N_SAMPLE_POINTS)

    tsdf = jax.block_until_ready(tsdf_transform_pallas(pt, sh, tr, qt))
    np.testing.assert_allclose(np.asarray(tsdf),
                               _numpy_reference(pt, sh, tr, qt),
                               rtol=1e-5, atol=1e-5)

    tsdf_mutex = jax.block_until_ready(
        tsdf_transform_pallas(pt, sh, tr, qt, if_mutex=True))
    np.testing.assert_allclose(np.asarray(tsdf_mutex),
                               _numpy_reference(pt, sh, tr, qt, if_mutex=True),
                               rtol=1e-5, atol=1e-5)

    # non-unit quaternions (exercise the |q|^2 scale in the R-matrix path)
    qt_nn = 1.7 * qt
    tsdf_nn = jax.block_until_ready(tsdf_transform_pallas(pt, sh, tr, qt_nn))
    np.testing.assert_allclose(np.asarray(tsdf_nn),
                               _numpy_reference(pt, sh, tr, qt_nn),
                               rtol=1e-5, atol=1e-5)

    # larger V: exercises lane padding (300 -> 384) and a multi-tile V grid
    pt2, sh2, tr2, qt2 = make_inputs(k_big, BATCH, PRIM_NUM, 300)
    tsdf2 = jax.block_until_ready(
        tsdf_transform_pallas(pt2, sh2, tr2, qt2, tile_v=128))
    np.testing.assert_allclose(np.asarray(tsdf2),
                               _numpy_reference(pt2, sh2, tr2, qt2),
                               rtol=1e-5, atol=1e-5)

    print("KERNEL_OK")
</pallas_src>

<mosaic_0001>
module attributes {stable_mosaic.version = 11 : i64} {
  func.func @_tsdf_transform_kernel(%arg0: i32, %arg1: i32, %arg2: memref<3x8x128xf32, #tpu.memory_space<vmem>>, %arg3: memref<8x3xf32, #tpu.memory_space<vmem>>, %arg4: memref<8x3xf32, #tpu.memory_space<vmem>>, %arg5: memref<8x4xf32, #tpu.memory_space<vmem>>, %arg6: memref<8x128xf32, #tpu.memory_space<vmem>>) attributes {dimension_semantics = [#tpu.dimension_semantics<parallel>, #tpu.dimension_semantics<parallel>], iteration_bounds = array<i64: 1, 1>, scalar_prefetch = 0 : i64, scratch_operands = 0 : i64, tpu.core_type = #tpu.core_type<tc>, window_params = [{transform_indices = @transform_0, window_bounds = array<i64: 3, 8, 128>}, {transform_indices = @transform_1, window_bounds = array<i64: 8, 3>}, {transform_indices = @transform_2, window_bounds = array<i64: 8, 3>}, {transform_indices = @transform_3, window_bounds = array<i64: 8, 4>}, {transform_indices = @transform_4, window_bounds = array<i64: 8, 128>}]} {
    %c0 = arith.constant 0 : index
    %c0_0 = arith.constant 0 : index
    %0 = vector.load %arg5[%c0, %c0_0] : memref<8x4xf32, #tpu.memory_space<vmem>>, vector<8x4xf32>
    %1 = vector.extract_strided_slice %0 {offsets = [0, 0], sizes = [8, 1], strides = [1, 1]} : vector<8x4xf32> to vector<8x1xf32>
    %2 = vector.extract_strided_slice %0 {offsets = [0, 1], sizes = [8, 1], strides = [1, 1]} : vector<8x4xf32> to vector<8x1xf32>
    %3 = vector.extract_strided_slice %0 {offsets = [0, 2], sizes = [8, 1], strides = [1, 1]} : vector<8x4xf32> to vector<8x1xf32>
    %4 = vector.extract_strided_slice %0 {offsets = [0, 3], sizes = [8, 1], strides = [1, 1]} : vector<8x4xf32> to vector<8x1xf32>
    %5 = arith.mulf %1, %1 : vector<8x1xf32>
    %6 = arith.mulf %2, %2 : vector<8x1xf32>
    %7 = arith.mulf %3, %3 : vector<8x1xf32>
    %8 = arith.mulf %4, %4 : vector<8x1xf32>
    %9 = arith.mulf %1, %2 : vector<8x1xf32>
    %10 = arith.mulf %1, %3 : vector<8x1xf32>
    %11 = arith.mulf %1, %4 : vector<8x1xf32>
    %12 = arith.mulf %2, %3 : vector<8x1xf32>
    %13 = arith.mulf %2, %4 : vector<8x1xf32>
    %14 = arith.mulf %3, %4 : vector<8x1xf32>
    %15 = arith.addf %5, %6 : vector<8x1xf32>
    %16 = arith.subf %15, %7 : vector<8x1xf32>
    %17 = arith.subf %16, %8 : vector<8x1xf32>
    %18 = arith.subf %12, %11 : vector<8x1xf32>
    %cst = arith.constant 2.000000e+00 : f32
    %19 = vector.broadcast %cst : f32 to vector<8x1xf32>
    %20 = arith.mulf %19, %18 : vector<8x1xf32>
    %21 = arith.addf %13, %10 : vector<8x1xf32>
    %cst_1 = arith.constant 2.000000e+00 : f32
    %22 = vector.broadcast %cst_1 : f32 to vector<8x1xf32>
    %23 = arith.mulf %22, %21 : vector<8x1xf32>
    %24 = arith.addf %12, %11 : vector<8x1xf32>
    %cst_2 = arith.constant 2.000000e+00 : f32
    %25 = vector.broadcast %cst_2 : f32 to vector<8x1xf32>
    %26 = arith.mulf %25, %24 : vector<8x1xf32>
    %27 = arith.subf %5, %6 : vector<8x1xf32>
    %28 = arith.addf %27, %7 : vector<8x1xf32>
    %29 = arith.subf %28, %8 : vector<8x1xf32>
    %30 = arith.subf %14, %9 : vector<8x1xf32>
    %cst_3 = arith.constant 2.000000e+00 : f32
    %31 = vector.broadcast %cst_3 : f32 to vector<8x1xf32>
    %32 = arith.mulf %31, %30 : vector<8x1xf32>
    %33 = arith.subf %13, %10 : vector<8x1xf32>
    %cst_4 = arith.constant 2.000000e+00 : f32
    %34 = vector.broadcast %cst_4 : f32 to vector<8x1xf32>
    %35 = arith.mulf %34, %33 : vector<8x1xf32>
    %36 = arith.addf %14, %9 : vector<8x1xf32>
    %cst_5 = arith.constant 2.000000e+00 : f32
    %37 = vector.broadcast %cst_5 : f32 to vector<8x1xf32>
    %38 = arith.mulf %37, %36 : vector<8x1xf32>
    %39 = arith.subf %5, %6 : vector<8x1xf32>
    %40 = arith.subf %39, %7 : vector<8x1xf32>
    %41 = arith.addf %40, %8 : vector<8x1xf32>
    %c0_6 = arith.constant 0 : index
    %c0_7 = arith.constant 0 : index
    %42 = vector.load %arg4[%c0_6, %c0_7] : memref<8x3xf32, #tpu.memory_space<vmem>>, vector<8x3xf32>
    %43 = vector.extract_strided_slice %42 {offsets = [0, 0], sizes = [8, 1], strides = [1, 1]} : vector<8x3xf32> to vector<8x1xf32>
    %44 = vector.extract_strided_slice %42 {offsets = [0, 1], sizes = [8, 1], strides = [1, 1]} : vector<8x3xf32> to vector<8x1xf32>
    %45 = vector.extract_strided_slice %42 {offsets = [0, 2], sizes = [8, 1], strides = [1, 1]} : vector<8x3xf32> to vector<8x1xf32>
    %46 = arith.mulf %17, %43 : vector<8x1xf32>
    %47 = arith.mulf %20, %44 : vector<8x1xf32>
    %48 = arith.addf %46, %47 : vector<8x1xf32>
    %49 = arith.mulf %23, %45 : vector<8x1xf32>
    %50 = arith.addf %48, %49 : vector<8x1xf32>
    %51 = arith.mulf %26, %43 : vector<8x1xf32>
    %52 = arith.mulf %29, %44 : vector<8x1xf32>
    %53 = arith.addf %51, %52 : vector<8x1xf32>
    %54 = arith.mulf %32, %45 : vector<8x1xf32>
    %55 = arith.addf %53, %54 : vector<8x1xf32>
    %56 = arith.mulf %35, %43 : vector<8x1xf32>
    %57 = arith.mulf %38, %44 : vector<8x1xf32>
    %58 = arith.addf %56, %57 : vector<8x1xf32>
    %59 = arith.mulf %41, %45 : vector<8x1xf32>
    %60 = arith.addf %58, %59 : vector<8x1xf32>
    %c0_8 = arith.constant 0 : index
    %c0_9 = arith.constant 0 : index
    %61 = vector.load %arg3[%c0_8, %c0_9] : memref<8x3xf32, #tpu.memory_space<vmem>>, vector<8x3xf32>
    %62 = math.absf %61 : vector<8x3xf32>
    %63 = vector.extract_strided_slice %62 {offsets = [0, 0], sizes = [8, 1], strides = [1, 1]} : vector<8x3xf32> to vector<8x1xf32>
    %64 = vector.extract_strided_slice %62 {offsets = [0, 1], sizes = [8, 1], strides = [1, 1]} : vector<8x3xf32> to vector<8x1xf32>
    %65 = vector.extract_strided_slice %62 {offsets = [0, 2], sizes = [8, 1], strides = [1, 1]} : vector<8x3xf32> to vector<8x1xf32>
    %c0_i32 = arith.constant 0 : i32
    %c128_i32 = arith.constant 128 : i32
    %66 = arith.muli %c0_i32, %c128_i32 : i32
    %67 = tpu.assume_multiple %66, 128 : i32
    %c0_10 = arith.constant 0 : index
    %c0_11 = arith.constant 0 : index
    %68 = arith.index_cast %67 : i32 to index
    %69 = vector.load %arg2[%c0_10, %c0_11, %68] : memref<3x8x128xf32, #tpu.memory_space<vmem>>, vector<1x8x128xf32>
    %70 = vector.shape_cast %69 : vector<1x8x128xf32> to vector<8x128xf32>
    %c1 = arith.constant 1 : index
    %c0_12 = arith.constant 0 : index
    %71 = arith.index_cast %67 : i32 to index
    %72 = vector.load %arg2[%c1, %c0_12, %71] : memref<3x8x128xf32, #tpu.memory_space<vmem>>, vector<1x8x128xf32>
    %73 = vector.shape_cast %72 : vector<1x8x128xf32> to vector<8x128xf32>
    %c2 = arith.constant 2 : index
    %c0_13 = arith.constant 0 : index
    %74 = arith.index_cast %67 : i32 to index
    %75 = vector.load %arg2[%c2, %c0_13, %74] : memref<3x8x128xf32, #tpu.memory_space<vmem>>, vector<1x8x128xf32>
    %76 = vector.shape_cast %75 : vector<1x8x128xf32> to vector<8x128xf32>
    %77 = vector.broadcast %17 : vector<8x1xf32> to vector<8x128xf32>
    %78 = arith.mulf %77, %70 : vector<8x128xf32>
    %79 = vector.broadcast %20 : vector<8x1xf32> to vector<8x128xf32>
    %80 = arith.mulf %79, %73 : vector<8x128xf32>
    %81 = arith.addf %78, %80 : vector<8x128xf32>
    %82 = vector.broadcast %23 : vector<8x1xf32> to vector<8x128xf32>
    %83 = arith.mulf %82, %76 : vector<8x128xf32>
    %84 = arith.addf %81, %83 : vector<8x128xf32>
    %85 = vector.broadcast %50 : vector<8x1xf32> to vector<8x128xf32>
    %86 = arith.subf %84, %85 : vector<8x128xf32>
    %87 = math.absf %86 : vector<8x128xf32>
    %88 = vector.broadcast %26 : vector<8x1xf32> to vector<8x128xf32>
    %89 = arith.mulf %88, %70 : vector<8x128xf32>
    %90 = vector.broadcast %29 : vector<8x1xf32> to vector<8x128xf32>
    %91 = arith.mulf %90, %73 : vector<8x128xf32>
    %92 = arith.addf %89, %91 : vector<8x128xf32>
    %93 = vector.broadcast %32 : vector<8x1xf32> to vector<8x128xf32>
    %94 = arith.mulf %93, %76 : vector<8x128xf32>
    %95 = arith.addf %92, %94 : vector<8x128xf32>
    %96 = vector.broadcast %55 : vector<8x1xf32> to vector<8x128xf32>
    %97 = arith.subf %95, %96 : vector<8x128xf32>
    %98 = math.absf %97 : vector<8x128xf32>
    %99 = vector.broadcast %35 : vector<8x1xf32> to vector<8x128xf32>
    %100 = arith.mulf %99, %70 : vector<8x128xf32>
    %101 = vector.broadcast %38 : vector<8x1xf32> to vector<8x128xf32>
    %102 = arith.mulf %101, %73 : vector<8x128xf32>
    %103 = arith.addf %100, %102 : vector<8x128xf32>
    %104 = vector.broadcast %41 : vector<8x1xf32> to vector<8x128xf32>
    %105 = arith.mulf %104, %76 : vector<8x128xf32>
    %106 = arith.addf %103, %105 : vector<8x128xf32>
    %107 = vector.broadcast %60 : vector<8x1xf32> to vector<8x128xf32>
    %108 = arith.subf %106, %107 : vector<8x128xf32>
    %109 = math.absf %108 : vector<8x128xf32>
    %110 = vector.broadcast %63 : vector<8x1xf32> to vector<8x128xf32>
    %111 = arith.subf %87, %110 : vector<8x128xf32>
    %cst_14 = arith.constant 0.000000e+00 : f32
    %112 = vector.broadcast %cst_14 : f32 to vector<8x128xf32>
    %113 = arith.maximumf %111, %112 : vector<8x128xf32>
    %114 = vector.broadcast %64 : vector<8x1xf32> to vector<8x128xf32>
    %115 = arith.subf %98, %114 : vector<8x128xf32>
    %cst_15 = arith.constant 0.000000e+00 : f32
    %116 = vector.broadcast %cst_15 : f32 to vector<8x128xf32>
    %117 = arith.maximumf %115, %116 : vector<8x128xf32>
    %118 = vector.broadcast %65 : vector<8x1xf32> to vector<8x128xf32>
    %119 = arith.subf %109, %118 : vector<8x128xf32>
    %cst_16 = arith.constant 0.000000e+00 : f32
    %120 = vector.broadcast %cst_16 : f32 to vector<8x128xf32>
    %121 = arith.maximumf %119, %120 : vector<8x128xf32>
    %122 = arith.mulf %113, %113 : vector<8x128xf32>
    %123 = arith.mulf %117, %117 : vector<8x128xf32>
    %124 = arith.addf %122, %123 : vector<8x128xf32>
    %125 = arith.mulf %121, %121 : vector<8x128xf32>
    %126 = arith.addf %124, %125 : vector<8x128xf32>
    %c0_17 = arith.constant 0 : index
    %127 = arith.index_cast %67 : i32 to index
    %128 = vector.load %arg6[%c0_17, %127] : memref<8x128xf32, #tpu.memory_space<vmem>>, vector<8x128xf32>
    tpu.vector_store %arg6[%c0_17, %127], %126 {strides = array<i32>} : memref<8x128xf32, #tpu.memory_space<vmem>>, vector<8x128xf32>,
    %c1_i32 = arith.constant 1 : i32
    return
  }
  func.func @transform_0(%arg0: i32, %arg1: i32) -> (i32, i32, i32) {
    %c0_i32 = arith.constant 0 : i32
    %c0_i32_0 = arith.constant 0 : i32
    return %c0_i32, %arg0, %arg1 : i32, i32, i32
  }
  func.func @transform_1(%arg0: i32, %arg1: i32) -> (i32, i32) {
    %c0_i32 = arith.constant 0 : i32
    %c0_i32_0 = arith.constant 0 : i32
    return %arg0, %c0_i32 : i32, i32
  }
  func.func @transform_2(%arg0: i32, %arg1: i32) -> (i32, i32) {
    %c0_i32 = arith.constant 0 : i32
    %c0_i32_0 = arith.constant 0 : i32
    return %arg0, %c0_i32 : i32, i32
  }
  func.func @transform_3(%arg0: i32, %arg1: i32) -> (i32, i32) {
    %c0_i32 = arith.constant 0 : i32
    %c0_i32_0 = arith.constant 0 : i32
    return %arg0, %c0_i32 : i32, i32
  }
  func.func @transform_4(%arg0: i32, %arg1: i32) -> (i32, i32) {
    %c0_i32 = arith.constant 0 : i32
    return %arg0, %arg1 : i32, i32
  }
}

</mosaic_0001>

<bundles_post_ra>
// kernel: tsdf_transform_pallas.1
= control target key start
LH: loop header
LB: loop body
LE: loop exit
PB: predicated region body
PF: predicated region fallthrough
CT: control target
= control target key end

     0   :  { %s390_s0 = inlined_call_operand.vmem [shape: f32[3,8,128], index: 0, kind: input, shape index: {}]   ;;  %s391_s1 = inlined_call_operand.vmem [shape: f32[8,3], index: 1, kind: input, shape index: {}]   ;;  %s392_s2 = inlined_call_operand.vmem [shape: f32[8,3], index: 2, kind: input, shape index: {}]   ;;  %s393_s3 = inlined_call_operand.vmem [shape: f32[8,4], index: 3, kind: input, shape index: {}]   ;;  %s394_s4 = inlined_call_operand.hbm [shape: f32[8,128], index: 4, kind: output, shape index: {}]  }
   0x1   :  { %v18_v0 = vld [vmem:[%s393_s3] sm:$0xff] }
   0x2   :  { %9 = vsyncpa [#allocation3], 0  ;;  %s306_s17 = smov 126   ;;  %s307_s18 = smov 125   ;;  %v19_v1 = vmul.f32 %v18_v0, %v18_v0  ;;  %v348_v2 = vld [vmem:[%s392_s2] sm:$0xff]  ;;  %v311_v19 = vmov 0  }
   0x3   :  { %25 = vrot.lane.b32.xlu1 %v18_v0, %s306_s17  ;;  %29 = vrot.lane.b32.xlu0 %v18_v0, %s307_s18  ;;  %s308_s19 = smov 127   ;;  %s309_s3 = smov 1   ;;  %v312_v20 = vmov 1   ;;  %v313_v45 = vmov 2   ;;  %v125_v47 = vld [vmem:[%s391_s1] sm:$0xff] }
   0x4   :  { %38 = vrot.lane.b32.xlu2 %v19_v1, %s306_s17  ;;  %s310_s22 = smov 2   ;;  %269 = vset.pattern.permute.xlu0 %v311_v19  ;;  %v126_v48 = vand.u32 2147483647, %v125_v47  ;;  %s247_s6 = sshll.u32 %s394_s4, 4  ;;  %s248_s6 = int_to_ptr.hbm [resolvable:$true] %s247_s6 }
   0x5   :  { %271 = vset.pattern.permute.xlu2 %v312_v20  ;;  %270 = vset.pattern.permute.xlu1 %v312_v20 }
   0xb   :  { %21 = vrot.lane.b32.xlu0 %v18_v0, %s308_s19  ;;  %34 = vrot.lane.b32.xlu1 %v19_v1, %s308_s19 }
  0x13   :  { %42 = vrot.lane.b32.xlu0 %v19_v1, %s307_s18 }
  0x1b   :  { %84 = vrot.lane.b32.xlu0 %v348_v2, %s308_s19 }
  0x5e   :  { %v39_v11 = vpop.permute.xlu2 %38 }
  0x75   :  { %v26_v3 = vpop.permute.xlu1 %25  ;;  %v30_v4 = vpop.permute.xlu0 %29 }
  0x76   :  { %v352_v5 = vmul.f32 %v26_v3, %v18_v0  ;;  %v32_v6 = vmul.f32 %v30_v4, %v18_v0 }
  0x78   :  { %47 = vrot.lane.b32.xlu2 %v32_v6, %s309_s3  ;;  %53 = vrot.lane.b32.xlu1 %v352_v5, %s309_s3  ;;  %v258_v6 = vld [vmem:[%s390_s0 + $0x8] sm:$0xff] }
  0x7d   :  { %v22_v7 = vpop.permute.xlu0 %21  ;;  %v35_v9 = vpop.permute.xlu1 %34 }
  0x7e   :  { %v24_v8 = vmul.f32 %v22_v7, %v18_v0  ;;  %v60_v10 = vsub.f32 %v19_v1, %v35_v9  ;;  %v37_v28 = vadd.f32 %v35_v9, %v19_v1 }
  0x80   :  { %64 = vrot.lane.b32.xlu2 %v24_v8, %s310_s22  ;;  %93 = vrot.lane.b32.xlu1 %v348_v2, %s309_s3  ;;  %v61_v13 = vadd.f32 %v60_v10, %v39_v11  ;;  %v73_v17 = vsub.f32 %v60_v10, %v39_v11  ;;  %v41_v31 = vsub.f32 %v37_v28, %v39_v11  ;;  %v127_v10 = vld [vmem:[%s390_s0] sm:$0xff] }
  0x85   :  { %v43_v12 = vpop.permute.xlu0 %42 }
  0x86   :  { %v62_v14 = vsub.f32 %v61_v13, %v43_v12  ;;  %v74_v18 = vadd.f32 %v73_v17, %v43_v12  ;;  %v45_v33 = vsub.f32 %v41_v31, %v43_v12  ;;  %v259_v12 = vld [vmem:[%s390_s0 + $0x10] sm:$0xff]  ;;  %s314_s0 = smov [#allocation2]  }
  0x87   :  { %s245_s29 = sshll.u32 %s314_s0, 4  ;;  %s246_s29 = int_to_ptr.vmem [resolvable:$true] %s245_s29 }
  0x88   :  { %116 = vrot.lane.b32.xlu2 %v348_v2, %s306_s17  ;;  %v76_v55 = vmul.f32 %v348_v2, %v45_v33 }
  0x8d   :  { %v85_v15 = vpop.permute.xlu0 %84 }
  0x8e   :  { %v97_v16 = vmul.f32 %v85_v15, %v62_v14 }
  0x90   :  { %99 = vrot.lane.b32.xlu2 %v97_v16, %s309_s3 }
  0xd2   :  { %v48_v21 = vpop.permute.xlu2 %47 }
  0xd3   :  { %v50_v22 = vsub.f32 %v24_v8, %v48_v21  ;;  %v58_v38 = vadd.f32 %v48_v21, %v24_v8 }
  0xd5   :  { %v51_v23 = vmul.f32 2.0, %v50_v22  ;;  %v59_v41 = vmul.f32 2.0, %v58_v38 }
  0xd7   :  { %v77_v24 = vmul.f32 %v348_v2, %v51_v23 }
  0xd9   :  { %79 = vrot.lane.b32.xlu0 %v77_v24, %s308_s19 }
  0xda   :  { %v65_v25 = vpop.permute.xlu2 %64 }
  0xdb   :  { %v67_v26 = vsub.f32 %v24_v8, %v65_v25  ;;  %v71_v39 = vadd.f32 %v65_v25, %v24_v8 }
  0xdd   :  { %v68_v27 = vmul.f32 2.0, %v67_v26  ;;  %v72_v42 = vmul.f32 2.0, %v71_v39 }
  0xdf   :  { %v103_v29 = vmul.f32 %v348_v2, %v68_v27 }
  0xe1   :  { %105 = vrot.lane.b32.xlu0 %v103_v29, %s308_s19 }
  0xe2   :  { %v117_v30 = vpop.permute.xlu2 %116 }
  0xe3   :  { %v119_v32 = vmul.f32 %v117_v30, %v74_v18 }
  0xe5   :  { %121 = vrot.lane.b32.xlu2 %v119_v32, %s309_s3 }
  0xe9   :  { %136 = vperm.xlu0 %269, %v45_v33  }
  0xea   :  { %v54_v34 = vpop.permute.xlu1 %53  ;;  %v100_v51 = vpop.permute.xlu2 %99 }
  0xeb   :  { %v56_v35 = vadd.f32 %v54_v34, %v352_v5  ;;  %v69_v44 = vsub.f32 %v352_v5, %v54_v34 }
  0xed   :  { %v57_v36 = vmul.f32 2.0, %v56_v35  ;;  %v70_v46 = vmul.f32 2.0, %v69_v44 }
  0xef   :  { %149 = vperm.xlu2 %271, %v57_v36   ;;  %v87_v37 = vmul.f32 %v85_v15, %v57_v36 }
  0xf1   :  { %169 = vperm.xlu0 %269, %v62_v14   ;;  %89 = vrot.lane.b32.xlu1 %v87_v37, %s308_s19 }
  0xf2   :  { %v94_v40 = vpop.permute.xlu1 %93 }
  0xf3   :  { %v110_v43 = vmul.f32 %v94_v40, %v72_v42  ;;  %v96_v50 = vmul.f32 %v94_v40, %v59_v41  ;;  %v109_v59 = vmul.f32 %v94_v40, %v70_v46 }
  0xf5   :  { %v102_v52 = vadd.f32 %v100_v51, %v96_v50 }
  0xf7   :  { %163 = vperm.xlu2 %271, %v59_v41  }
  0xf9   :  { %273 = vset.pattern.permute.xlu0 %v313_v45  ;;  %112 = vrot.lane.b32.xlu1 %v110_v43, %s308_s19 }
  0xfa   :  { %196 = vperm.xlu0 %273, %v72_v42  }
  0xff   :  { %190 = vperm.xlu2 %271, %v70_v46  }
 0x101   :  { %142 = vperm.xlu1 %270, %v51_v23  }
 0x102   :  { %277 = vset.pattern.permute.xlu0 %v312_v20 }
 0x103   :  { %223 = vperm.xlu0 %277, %v126_v48  }
 0x109   :  { %272 = vset.pattern.permute.xlu1 %v313_v45 }
 0x10a   :  { %176 = vperm.xlu1 %272, %v68_v27  }
 0x10b   :  { %279 = vset.pattern.permute.xlu0 %v313_v45 }
 0x112   :  { %274 = vset.pattern.permute.xlu1 %v311_v19 }
 0x113   :  { %203 = vperm.xlu1 %274, %v74_v18  }
 0x13f   :  { %v122_v62 = vpop.permute.xlu2 %121 }
 0x149   :  { %v150_v0 = vpop.permute.xlu2 %149 }
 0x14a   :  { %v152_v15 = vmul.f32 %v259_v12, %v150_v0 }
 0x14b   :  { %v80_v49 = vpop.permute.xlu0 %79 }
 0x14c   :  { %v82_v56 = vadd.f32 %v80_v49, %v76_v55 }
 0x151   :  { %v164_v3 = vpop.permute.xlu2 %163 }
 0x152   :  { %v166_v16 = vmul.f32 %v164_v3, %v127_v10 }
 0x153   :  { %v106_v53 = vpop.permute.xlu0 %105 }
 0x154   :  { %v108_v54 = vadd.f32 %v106_v53, %v102_v52 }
 0x156   :  { %183 = vperm.xlu2 %271, %v108_v54  }
 0x159   :  { %v191_v2 = vpop.permute.xlu2 %190 }
 0x15a   :  { %v193_v27 = vmul.f32 %v191_v2, %v127_v10 }
 0x15b   :  { %v137_v4 = vpop.permute.xlu0 %136 }
 0x15c   :  { %v139_v11 = vmul.f32 %v137_v4, %v127_v10 }
 0x15e   :  { %276 = vset.pattern.permute.xlu2 %v311_v19 }
 0x15f   :  { %217 = vperm.xlu2 %276, %v126_v48  }
 0x163   :  { %v90_v57 = vpop.permute.xlu1 %89  ;;  %v170_v7 = vpop.permute.xlu0 %169 }
 0x164   :  { %v92_v58 = vadd.f32 %v90_v57, %v82_v56  ;;  %v172_v13 = vmul.f32 %v258_v6, %v170_v7 }
 0x166   :  { %156 = vperm.xlu1 %274, %v92_v58  }
 0x16b   :  { %v113_v60 = vpop.permute.xlu1 %112 }
 0x16c   :  { %v115_v61 = vadd.f32 %v113_v60, %v109_v59  ;;  %v197_v22 = vpop.permute.xlu0 %196 }
 0x16d   :  { %v199_v25 = vmul.f32 %v258_v6, %v197_v22 }
 0x16e   :  { %v124_v63 = vadd.f32 %v122_v62, %v115_v61  ;;  %275 = vset.pattern.permute.xlu1 %v312_v20  ;;  %v173_v20 = vadd.f32 %v172_v13, %v166_v16 }
 0x16f   :  { %v200_v31 = vadd.f32 %v199_v25, %v193_v27 }
 0x170   :  { %210 = vperm.xlu1 %275, %v124_v63  }
 0x173   :  { %v143_v1 = vpop.permute.xlu1 %142 }
 0x174   :  { %v145_v9 = vmul.f32 %v258_v6, %v143_v1 }
 0x175   :  { %v224_v34 = vpop.permute.xlu0 %223 }
 0x176   :  { %v146_v14 = vadd.f32 %v145_v9, %v139_v11 }
 0x178   :  { %278 = vset.pattern.permute.xlu1 %v313_v45  ;;  %v153_v21 = vadd.f32 %v152_v15, %v146_v14 }
 0x179   :  { %229 = vperm.xlu1 %278, %v126_v48  }
 0x17c   :  { %v177_v5 = vpop.permute.xlu1 %176 }
 0x17d   :  { %v179_v17 = vmul.f32 %v259_v12, %v177_v5 }
 0x17f   :  { %v180_v23 = vadd.f32 %v179_v17, %v173_v20 }
 0x185   :  { %v204_v8 = vpop.permute.xlu1 %203 }
 0x186   :  { %v206_v28 = vmul.f32 %v259_v12, %v204_v8 }
 0x188   :  { %v207_v36 = vadd.f32 %v206_v28, %v200_v31 }
 0x1b0   :  { %v184_v18 = vpop.permute.xlu2 %183 }
 0x1b1   :  { %v186_v26 = vsub.f32 %v180_v23, %v184_v18 }
 0x1b3   :  { %v187_v32 = vand.u32 2147483647, %v186_v26 }
 0x1b5   :  { %v226_v37 = vsub.f32 %v187_v32, %v224_v34 }
 0x1b7   :  { %v227_v40 = vmax.f32 %v226_v37, 0.0 }
 0x1b9   :  { %v218_v30 = vpop.permute.xlu2 %217  ;;  %v235_v45 = vmul.f32 %v227_v40, %v227_v40 }
 0x1d8   :  { %v157_v19 = vpop.permute.xlu1 %156 }
 0x1d9   :  { %v159_v24 = vsub.f32 %v153_v21, %v157_v19 }
 0x1db   :  { %v160_v29 = vand.u32 2147483647, %v159_v24 }
 0x1dd   :  { %v220_v35 = vsub.f32 %v160_v29, %v218_v30 }
 0x1df   :  { %v221_v39 = vmax.f32 %v220_v35, 0.0 }
 0x1e1   :  { %v234_v43 = vmul.f32 %v221_v39, %v221_v39 }
 0x1e2   :  { %v211_v33 = vpop.permute.xlu1 %210 }
 0x1e3   :  { %v213_v38 = vsub.f32 %v207_v36, %v211_v33  ;;  %v236_v47 = vadd.f32 %v235_v45, %v234_v43 }
 0x1e5   :  { %v214_v41 = vand.u32 2147483647, %v213_v38 }
 0x1eb   :  { %v230_v42 = vpop.permute.xlu1 %229 }
 0x1ec   :  { %v232_v44 = vsub.f32 %v214_v41, %v230_v42 }
 0x1ee   :  { %v233_v46 = vmax.f32 %v232_v44, 0.0 }
 0x1f0   :  { %v237_v48 = vmul.f32 %v233_v46, %v233_v46 }
 0x1f2   :  { %v238_v49 = vadd.f32 %v237_v48, %v236_v47 }
 0x1f4   :  { %239 = vst [vmem:[#allocation2] sm:$0xff] %v238_v49 }
 0x1f5   :  { %250 = dma.vmem_to_hbm [thread:$0]  %s246_s29, 128, %s248_s6, [#allocation3]  }
 0x1f6   :  { %304 = dma.done.wait [#allocation3], 128  }
 0x1f7   :  { %305 = vsyncadd [#allocation3], 4294967168 }
 0x1f8   :  { %255 = vsyncpa [#allocation3], 1 }

</bundles_post_ra>
